<compile_context>
chip_gen: v6e
topology: v6e:2x2x1
jax: 0.10.0
libtpu: 0.0.40
codegen_flags: <defaults>
</compile_context>

<pallas_src>
import math
import functools

import jax
import jax.numpy as jnp
from jax import lax
from jax.experimental import pallas as pl
from jax.experimental.pallas import tpu as pltpu


# ----------------------------------------------------------------------------
# Hardware-generation-aware configuration.
# ----------------------------------------------------------------------------
def _hw_config():
    try:
        kind = jax.devices()[0].device_kind.lower()
    except Exception:
        kind = ""
    if "v7" in kind:
        # 64 MiB VMEM per TensorCore: leave headroom for compiler scratch.
        return dict(vmem=48 * 1024 * 1024, attn_tq=256,
                    lin=(512, 512, 512), nk_align=256)
    if "v6" in kind:
        # 128 MiB VMEM: larger tiles amortize per-step pipeline overhead.
        return dict(vmem=100 * 1024 * 1024, attn_tq=512,
                    lin=(512, 1024, 1024), nk_align=256)
    if "v5" in kind:
        # 128 MiB VMEM, HBM-bandwidth constrained, 128x128 MXU passes.
        return dict(vmem=100 * 1024 * 1024, attn_tq=512,
                    lin=(512, 512, 512), nk_align=128)
    return dict(vmem=64 * 1024 * 1024, attn_tq=256,
                lin=(512, 512, 512), nk_align=128)


def _pick_tile(dim, preferred, align):
    """Largest tile <= preferred that divides `dim` and is a multiple of an
    alignment <= `align` (tries align, then 128, then 8); falls back to the
    full dim (always a legal TPU block)."""
    if dim <= preferred:
        return dim
    for a in (align, 128, 8):
        if a > align:
            continue
        t = (preferred // a) * a
        while t >= a:
            if dim % t == 0:
                return t
            t -= a
    return dim


# ----------------------------------------------------------------------------
# Kernel 1: tiled fused linear (x @ W + b) -- used for c_attn and c_proj.
# ----------------------------------------------------------------------------
def _linear_kernel(x_ref, w_ref, b_ref, o_ref, acc_ref):
    @pl.when(pl.program_id(2) == 0)
    def _init():
        acc_ref[...] = jnp.zeros(acc_ref.shape, jnp.float32)

    acc_ref[...] += jnp.dot(x_ref[...], w_ref[...],
                            preferred_element_type=jnp.float32)

    @pl.when(pl.program_id(2) == pl.num_programs(2) - 1)
    def _finalize():
        # Bias add + downcast only once, on the final K step.
        o_ref[...] = (acc_ref[...] + b_ref[...].astype(jnp.float32)
                      ).astype(o_ref.dtype)


def linear(x2d, w, b):
    # x2d: (M, K), w: (K, N), b: (1, N)
    m, k = x2d.shape
    kw, n = w.shape
    assert kw == k and b.shape == (1, n)

    cfg = _hw_config()
    tm_pref, tn_pref, tk_pref = cfg["lin"]
    tm = _pick_tile(m, tm_pref, 8)
    tn = _pick_tile(n, tn_pref, cfg["nk_align"])
    tk = _pick_tile(k, tk_pref, cfg["nk_align"])
    grid = (m // tm, n // tn, k // tk)

    return pl.pallas_call(
        _linear_kernel,
        out_shape=jax.ShapeDtypeStruct((m, n), x2d.dtype),
        grid_spec=pltpu.PrefetchScalarGridSpec(
            num_scalar_prefetch=0,
            grid=grid,
            in_specs=[
                pl.BlockSpec((tm, tk), lambda i, j, kk: (i, kk)),
                pl.BlockSpec((tk, tn), lambda i, j, kk: (kk, j)),
                pl.BlockSpec((1, tn), lambda i, j, kk: (0, j)),
            ],
            out_specs=pl.BlockSpec((tm, tn), lambda i, j, kk: (i, j)),
            scratch_shapes=[pltpu.VMEM((tm, tn), jnp.float32)],
        ),
        compiler_params=pltpu.CompilerParams(
            dimension_semantics=("parallel", "parallel", "arbitrary"),
            vmem_limit_bytes=cfg["vmem"],
        ),
    )(x2d, w, b)


# ----------------------------------------------------------------------------
# Kernel 2: causal flash attention.
#   q_ref : (1, tq,  C)  query rows   (block index 0 of the fused qkv buffer)
#   k_ref : (1, tkv, C)  key rows     (block index 1)
#   v_ref : (1, tkv, C)  value rows   (block index 2)
#   o_ref : (1, tq,  C)  output in (B, T, C) layout
#   scratch: q (n_head, tq, hd) [input dtype, pre-scaled],
#            m (n_head, tq, 1), l (n_head, tq, 1), acc (n_head, tq, hd) [fp32]
# ----------------------------------------------------------------------------
def _flash_attn_kernel(q_ref, k_ref, v_ref, o_ref,
                       q_sc, m_sc, l_sc, acc_sc, *,
                       n_head, head_dim, scale):
    qi = pl.program_id(1)
    ki = pl.program_id(2)
    tq = q_ref.shape[1]
    tkv = k_ref.shape[1]
    hd = head_dim
    mask_val = -1e30  # safe: score path is fp32

    @pl.when(ki == 0)
    def _init():
        m_sc[...] = jnp.full(m_sc.shape, -jnp.inf, jnp.float32)
        l_sc[...] = jnp.zeros(l_sc.shape, jnp.float32)
        acc_sc[...] = jnp.zeros(acc_sc.shape, jnp.float32)
        # Hoist Q: slice + scale once per (b, qi), reuse for every kv block.
        # TODO(synk): for bf16 inputs, fold `scale` into the fp32 score path
        # instead to preserve a couple of mantissa bits.
        for h in range(n_head):
            q_sc[h] = q_ref[0, :, h * hd:(h + 1) * hd] * scale

    @pl.when(ki <= qi)   # ki > qi blocks are skipped entirely (causal)
    def _attend():
        # tq == tkv, so the diagonal mask needs no absolute-position offsets;
        # off-diagonal (ki < qi) blocks are fully unmasked via the runtime OR.
        row = lax.broadcasted_iota(jnp.int32, (tq, tkv), 0)
        col = lax.broadcasted_iota(jnp.int32, (tq, tkv), 1)
        keep = jnp.logical_or(ki < qi, col <= row)
        # Per-head matmuls are N=hd wide.  TODO(synk): for hd=64, pair heads
        # (2*hd=128) for fully lane-aligned K/V loads and a 128-wide acc.
        for h in range(n_head):
            k = k_ref[0, :, h * hd:(h + 1) * hd]          # (tkv, hd)
            v = v_ref[0, :, h * hd:(h + 1) * hd]          # (tkv, hd)
            # q @ k^T without materializing the transpose.
            s = lax.dot_general(q_sc[h], k, (((1,), (1,)), ((), ())),
                                preferred_element_type=jnp.float32)  # (tq,tkv)
            s = jnp.where(keep, s, mask_val)
            m_prev = m_sc[h]
            m_new = jnp.maximum(m_prev, jnp.max(s, axis=-1, keepdims=True))
            alpha = jnp.exp(m_prev - m_new)
            p = jnp.exp(s - m_new)
            l_sc[h] = alpha * l_sc[h] + jnp.sum(p, axis=-1, keepdims=True)
            acc_sc[h] = alpha * acc_sc[h] + jnp.dot(
                p.astype(v.dtype), v, preferred_element_type=jnp.float32)
            m_sc[h] = m_new

    @pl.when(ki == qi)   # diagonal block is the last processed kv block
    def _finalize():
        # Lane-dense output: concat per-head results and do ONE (tq, C) store.
        outs = []
        for h in range(n_head):
            inv_l = 1.0 / l_sc[h]          # exact reciprocal, once per q block
            outs.append(acc_sc[h] * inv_l)
        o_ref[0, :, :] = jnp.concatenate(outs, axis=-1).astype(o_ref.dtype)


def flash_attention(qkv, n_head):
    # qkv: (B, T, 3C)  -> returns y: (B, T, C)
    b, t, c3 = qkv.shape
    c = c3 // 3
    hd = c // n_head
    scale = 1.0 / math.sqrt(hd)
    cfg = _hw_config()

    tq = _pick_tile(t, cfg["attn_tq"], 8)
    tkv = tq                      # equal tiles keep the diagonal logic simple
    nq = t // tq

    kernel = functools.partial(_flash_attn_kernel, n_head=n_head,
                               head_dim=hd, scale=scale)

    # KV index_map is clamped to min(ki, qi) so skipped (ki > qi) iterations
    # reuse the previous block and issue no DMA.
    if c % 128 == 0:
        # Read Q/K/V directly out of the fused qkv buffer as three logical
        # inputs (last-dim block index 0/1/2): no host-side split, no 3C
        # over-fetch, no in-kernel region slicing.
        q_in = k_in = v_in = qkv
        q_spec = pl.BlockSpec((1, tq, c), lambda bi, qi, ki: (bi, qi, 0))
        k_spec = pl.BlockSpec((1, tkv, c),
                              lambda bi, qi, ki: (bi, jnp.minimum(ki, qi), 1))
        v_spec = pl.BlockSpec((1, tkv, c),
                              lambda bi, qi, ki: (bi, jnp.minimum(ki, qi), 2))
    else:
        # Small / odd C fallback: a C-wide block over a 3C array would violate
        # the lane-tiling rule, so split once outside the kernel instead.
        q_in, k_in, v_in = jnp.split(qkv, 3, axis=2)
        q_spec = pl.BlockSpec((1, tq, c), lambda bi, qi, ki: (bi, qi, 0))
        k_spec = pl.BlockSpec((1, tkv, c),
                              lambda bi, qi, ki: (bi, jnp.minimum(ki, qi), 0))
        v_spec = pl.BlockSpec((1, tkv, c),
                              lambda bi, qi, ki: (bi, jnp.minimum(ki, qi), 0))

    return pl.pallas_call(
        kernel,
        out_shape=jax.ShapeDtypeStruct((b, t, c), qkv.dtype),
        grid_spec=pltpu.PrefetchScalarGridSpec(
            num_scalar_prefetch=0,
            grid=(b, nq, nq),
            in_specs=[q_spec, k_spec, v_spec],
            out_specs=pl.BlockSpec((1, tq, c), lambda bi, qi, ki: (bi, qi, 0)),
            scratch_shapes=[
                pltpu.VMEM((n_head, tq, hd), qkv.dtype),    # pre-scaled Q
                pltpu.VMEM((n_head, tq, 1), jnp.float32),   # running max m
                pltpu.VMEM((n_head, tq, 1), jnp.float32),   # running sum l
                pltpu.VMEM((n_head, tq, hd), jnp.float32),  # output accumulator
            ],
        ),
        compiler_params=pltpu.CompilerParams(
            dimension_semantics=("parallel", "parallel", "arbitrary"),
            vmem_limit_bytes=cfg["vmem"],
        ),
    )(q_in, k_in, v_in)


# ----------------------------------------------------------------------------
# Full forward, matching the PyTorch module semantics.  The only ops between
# the kernels are free reshapes (plus a one-time split for tiny non-128 C).
# ----------------------------------------------------------------------------
@functools.partial(jax.jit, static_argnums=(2,))
def causal_self_attention(x, params, n_head):
    B, T, C = x.shape
    assert C % n_head == 0

    qkv = linear(x.reshape(B * T, C), params["w_attn"], params["b_attn"])
    qkv = qkv.reshape(B, T, 3 * C)                      # free reshape

    y = flash_attention(qkv, n_head)                    # (B, T, C)

    y = linear(y.reshape(B * T, C), params["w_proj"], params["b_proj"])
    return y.reshape(B, T, C)


# ----------------------------------------------------------------------------
# Pure-JAX reference (correctness check only).
# ----------------------------------------------------------------------------
def reference(x, params, n_head):
    B, T, C = x.shape
    hd = C // n_head
    qkv = x.reshape(B * T, C) @ params["w_attn"] + params["b_attn"]
    qkv = qkv.reshape(B, T, 3 * C)
    q, k, v = jnp.split(qkv, 3, axis=2)
    q = q.reshape(B, T, n_head, hd).transpose(0, 2, 1, 3)
    k = k.reshape(B, T, n_head, hd).transpose(0, 2, 1, 3)
    v = v.reshape(B, T, n_head, hd).transpose(0, 2, 1, 3)
    s = jnp.einsum("bhqd,bhkd->bhqk", q, k) / math.sqrt(hd)
    mask = jnp.tril(jnp.ones((T, T), bool))
    s = jnp.where(mask, s, -jnp.inf)
    p = jax.nn.softmax(s, axis=-1)
    y = jnp.einsum("bhqk,bhkd->bhqd", p, v)
    y = y.transpose(0, 2, 1, 3).reshape(B * T, C)
    y = y @ params["w_proj"] + params["b_proj"]
    return y.reshape(B, T, C)


if __name__ == "__main__":
    # Small config consistent with the module (n_embd % n_head == 0); C=128
    # exercises the fused-qkv three-BlockSpec fast path (C multiple of 128).
    B, T, C, n_head = 2, 8, 128, 2

    key = jax.random.PRNGKey(0)
    kx, kw1, kb1, kw2, kb2 = jax.random.split(key, 5)

    x = jax.random.normal(kx, (B, T, C), dtype=jnp.float32)

    # PyTorch Linear shapes, pre-transposed to (in, out) for the kernels.
    params = {
        "w_attn": 0.02 * jax.random.normal(kw1, (C, 3 * C), dtype=jnp.float32),
        "b_attn": 0.02 * jax.random.normal(kb1, (1, 3 * C), dtype=jnp.float32),
        "w_proj": 0.02 * jax.random.normal(kw2, (C, C), dtype=jnp.float32),
        "b_proj": 0.02 * jax.random.normal(kb2, (1, C), dtype=jnp.float32),
    }

    out = causal_self_attention(x, params, n_head)
    out = jax.block_until_ready(out)

    ref = reference(x, params, n_head)
    assert out.shape == (B, T, C)
    err = float(jnp.max(jnp.abs(out - ref)))
    assert jnp.allclose(out, ref, atol=2e-3, rtol=2e-3), \
        f"mismatch vs reference, max abs err {err}"

    print("KERNEL_OK")
</pallas_src>

<mosaic_0001>
module attributes {stable_mosaic.version = 11 : i64} {
  func.func @_linear_kernel(%arg0: i32, %arg1: i32, %arg2: i32, %arg3: memref<16x128xf32, #tpu.memory_space<vmem>>, %arg4: memref<128x128xf32, #tpu.memory_space<vmem>>, %arg5: memref<1x128xf32, #tpu.memory_space<vmem>>, %arg6: memref<16x128xf32, #tpu.memory_space<vmem>>, %arg7: memref<16x128xf32, #tpu.memory_space<vmem>>) attributes {dimension_semantics = [#tpu.dimension_semantics<parallel>, #tpu.dimension_semantics<parallel>, #tpu.dimension_semantics<arbitrary>], iteration_bounds = array<i64: 1, 1, 1>, scalar_prefetch = 0 : i64, scratch_operands = 1 : i64, tpu.core_type = #tpu.core_type<tc>, window_params = [{transform_indices = @transform_0, window_bounds = array<i64: 16, 128>}, {transform_indices = @transform_1, window_bounds = array<i64: 128, 128>}, {transform_indices = @transform_2, window_bounds = array<i64: 1, 128>}, {transform_indices = @transform_3, window_bounds = array<i64: 16, 128>}]} {
    %c0_i32 = arith.constant 0 : i32
    %0 = arith.cmpi eq, %arg2, %c0_i32 : i32
    %1 = arith.extui %0 : i1 to i32
    %c0_i32_0 = arith.constant 0 : i32
    %2 = arith.cmpi ne, %1, %c0_i32_0 : i32
    scf.if %2 {
      %cst_10 = arith.constant 0.000000e+00 : f32
      %12 = vector.broadcast %cst_10 : f32 to vector<16x128xf32>
      %c0_11 = arith.constant 0 : index
      %c0_12 = arith.constant 0 : index
      %13 = vector.load %arg7[%c0_11, %c0_12] : memref<16x128xf32, #tpu.memory_space<vmem>>, vector<16x128xf32>
      tpu.vector_store %arg7[%c0_11, %c0_12], %12 {strides = array<i32>} : memref<16x128xf32, #tpu.memory_space<vmem>>, vector<16x128xf32>,
    } else {
    }
    %c0 = arith.constant 0 : index
    %c0_1 = arith.constant 0 : index
    %3 = vector.load %arg7[%c0, %c0_1] : memref<16x128xf32, #tpu.memory_space<vmem>>, vector<16x128xf32>
    %c0_2 = arith.constant 0 : index
    %c0_3 = arith.constant 0 : index
    %4 = vector.load %arg3[%c0_2, %c0_3] : memref<16x128xf32, #tpu.memory_space<vmem>>, vector<16x128xf32>
    %c0_4 = arith.constant 0 : index
    %c0_5 = arith.constant 0 : index
    %5 = vector.load %arg4[%c0_4, %c0_5] : memref<128x128xf32, #tpu.memory_space<vmem>>, vector<128x128xf32>
    %cst = arith.constant dense<0.000000e+00> : vector<16x128xf32>
    %6 = tpu.matmul %4, %5, %cst {dimension_numbers = #tpu.dot_dimension_numbers<[1], [0], [0], [1], [0, 0, 1, 1], [], []>} : vector<16x128xf32>, vector<128x128xf32>, vector<16x128xf32> -> vector<16x128xf32>
    %7 = arith.addf %3, %6 : vector<16x128xf32>
    %c0_6 = arith.constant 0 : index
    %c0_7 = arith.constant 0 : index
    %8 = vector.load %arg7[%c0_6, %c0_7] : memref<16x128xf32, #tpu.memory_space<vmem>>, vector<16x128xf32>
    tpu.vector_store %arg7[%c0_6, %c0_7], %7 {strides = array<i32>} : memref<16x128xf32, #tpu.memory_space<vmem>>, vector<16x128xf32>,
    %c0_i32_8 = arith.constant 0 : i32
    %9 = arith.cmpi eq, %arg2, %c0_i32_8 : i32
    %10 = arith.extui %9 : i1 to i32
    %c0_i32_9 = arith.constant 0 : i32
    %11 = arith.cmpi ne, %10, %c0_i32_9 : i32
    scf.if %11 {
      %c0_10 = arith.constant 0 : index
      %c0_11 = arith.constant 0 : index
      %12 = vector.load %arg7[%c0_10, %c0_11] : memref<16x128xf32, #tpu.memory_space<vmem>>, vector<16x128xf32>
      %c0_12 = arith.constant 0 : index
      %c0_13 = arith.constant 0 : index
      %13 = vector.load %arg5[%c0_12, %c0_13] : memref<1x128xf32, #tpu.memory_space<vmem>>, vector<1x128xf32>
      %14 = vector.broadcast %13 : vector<1x128xf32> to vector<16x128xf32>
      %15 = arith.addf %12, %14 : vector<16x128xf32>
      %c0_14 = arith.constant 0 : index
      %c0_15 = arith.constant 0 : index
      %16 = vector.load %arg6[%c0_14, %c0_15] : memref<16x128xf32, #tpu.memory_space<vmem>>, vector<16x128xf32>
      tpu.vector_store %arg6[%c0_14, %c0_15], %15 {strides = array<i32>} : memref<16x128xf32, #tpu.memory_space<vmem>>, vector<16x128xf32>,
    } else {
    }
    return
  }
  func.func @transform_0(%arg0: i32, %arg1: i32, %arg2: i32) -> (i32, i32) {
    %c0_i32 = arith.constant 0 : i32
    return %arg0, %arg2 : i32, i32
  }
  func.func @transform_1(%arg0: i32, %arg1: i32, %arg2: i32) -> (i32, i32) {
    %c0_i32 = arith.constant 0 : i32
    return %arg2, %arg1 : i32, i32
  }
  func.func @transform_2(%arg0: i32, %arg1: i32, %arg2: i32) -> (i32, i32) {
    %c0_i32 = arith.constant 0 : i32
    %c0_i32_0 = arith.constant 0 : i32
    return %c0_i32, %arg1 : i32, i32
  }
  func.func @transform_3(%arg0: i32, %arg1: i32, %arg2: i32) -> (i32, i32) {
    %c0_i32 = arith.constant 0 : i32
    return %arg0, %arg1 : i32, i32
  }
}

module attributes {stable_mosaic.version = 11 : i64} {
  func.func @_linear_kernel(%arg0: i32, %arg1: i32, %arg2: i32, %arg3: memref<16x128xf32, #tpu.memory_space<vmem>>, %arg4: memref<128x384xf32, #tpu.memory_space<vmem>>, %arg5: memref<1x384xf32, #tpu.memory_space<vmem>>, %arg6: memref<16x384xf32, #tpu.memory_space<vmem>>, %arg7: memref<16x384xf32, #tpu.memory_space<vmem>>) attributes {dimension_semantics = [#tpu.dimension_semantics<parallel>, #tpu.dimension_semantics<parallel>, #tpu.dimension_semantics<arbitrary>], iteration_bounds = array<i64: 1, 1, 1>, scalar_prefetch = 0 : i64, scratch_operands = 1 : i64, tpu.core_type = #tpu.core_type<tc>, window_params = [{transform_indices = @transform_0, window_bounds = array<i64: 16, 128>}, {transform_indices = @transform_1, window_bounds = array<i64: 128, 384>}, {transform_indices = @transform_2, window_bounds = array<i64: 1, 384>}, {transform_indices = @transform_3, window_bounds = array<i64: 16, 384>}]} {
    %c0_i32 = arith.constant 0 : i32
    %0 = arith.cmpi eq, %arg2, %c0_i32 : i32
    %1 = arith.extui %0 : i1 to i32
    %c0_i32_0 = arith.constant 0 : i32
    %2 = arith.cmpi ne, %1, %c0_i32_0 : i32
    scf.if %2 {
      %cst_10 = arith.constant 0.000000e+00 : f32
      %12 = vector.broadcast %cst_10 : f32 to vector<16x384xf32>
      %c0_11 = arith.constant 0 : index
      %c0_12 = arith.constant 0 : index
      %13 = vector.load %arg7[%c0_11, %c0_12] : memref<16x384xf32, #tpu.memory_space<vmem>>, vector<16x384xf32>
      tpu.vector_store %arg7[%c0_11, %c0_12], %12 {strides = array<i32>} : memref<16x384xf32, #tpu.memory_space<vmem>>, vector<16x384xf32>,
    } else {
    }
    %c0 = arith.constant 0 : index
    %c0_1 = arith.constant 0 : index
    %3 = vector.load %arg7[%c0, %c0_1] : memref<16x384xf32, #tpu.memory_space<vmem>>, vector<16x384xf32>
    %c0_2 = arith.constant 0 : index
    %c0_3 = arith.constant 0 : index
    %4 = vector.load %arg3[%c0_2, %c0_3] : memref<16x128xf32, #tpu.memory_space<vmem>>, vector<16x128xf32>
    %c0_4 = arith.constant 0 : index
    %c0_5 = arith.constant 0 : index
    %5 = vector.load %arg4[%c0_4, %c0_5] : memref<128x384xf32, #tpu.memory_space<vmem>>, vector<128x384xf32>
    %cst = arith.constant dense<0.000000e+00> : vector<16x384xf32>
    %6 = tpu.matmul %4, %5, %cst {dimension_numbers = #tpu.dot_dimension_numbers<[1], [0], [0], [1], [0, 0, 1, 1], [], []>} : vector<16x128xf32>, vector<128x384xf32>, vector<16x384xf32> -> vector<16x384xf32>
    %7 = arith.addf %3, %6 : vector<16x384xf32>
    %c0_6 = arith.constant 0 : index
    %c0_7 = arith.constant 0 : index
    %8 = vector.load %arg7[%c0_6, %c0_7] : memref<16x384xf32, #tpu.memory_space<vmem>>, vector<16x384xf32>
    tpu.vector_store %arg7[%c0_6, %c0_7], %7 {strides = array<i32>} : memref<16x384xf32, #tpu.memory_space<vmem>>, vector<16x384xf32>,
    %c0_i32_8 = arith.constant 0 : i32
    %9 = arith.cmpi eq, %arg2, %c0_i32_8 : i32
    %10 = arith.extui %9 : i1 to i32
    %c0_i32_9 = arith.constant 0 : i32
    %11 = arith.cmpi ne, %10, %c0_i32_9 : i32
    scf.if %11 {
      %c0_10 = arith.constant 0 : index
      %c0_11 = arith.constant 0 : index
      %12 = vector.load %arg7[%c0_10, %c0_11] : memref<16x384xf32, #tpu.memory_space<vmem>>, vector<16x384xf32>
      %c0_12 = arith.constant 0 : index
      %c0_13 = arith.constant 0 : index
      %13 = vector.load %arg5[%c0_12, %c0_13] : memref<1x384xf32, #tpu.memory_space<vmem>>, vector<1x384xf32>
      %14 = vector.broadcast %13 : vector<1x384xf32> to vector<16x384xf32>
      %15 = arith.addf %12, %14 : vector<16x384xf32>
      %c0_14 = arith.constant 0 : index
      %c0_15 = arith.constant 0 : index
      %16 = vector.load %arg6[%c0_14, %c0_15] : memref<16x384xf32, #tpu.memory_space<vmem>>, vector<16x384xf32>
      tpu.vector_store %arg6[%c0_14, %c0_15], %15 {strides = array<i32>} : memref<16x384xf32, #tpu.memory_space<vmem>>, vector<16x384xf32>,
    } else {
    }
    return
  }
  func.func @transform_0(%arg0: i32, %arg1: i32, %arg2: i32) -> (i32, i32) {
    %c0_i32 = arith.constant 0 : i32
    return %arg0, %arg2 : i32, i32
  }
  func.func @transform_1(%arg0: i32, %arg1: i32, %arg2: i32) -> (i32, i32) {
    %c0_i32 = arith.constant 0 : i32
    return %arg2, %arg1 : i32, i32
  }
  func.func @transform_2(%arg0: i32, %arg1: i32, %arg2: i32) -> (i32, i32) {
    %c0_i32 = arith.constant 0 : i32
    %c0_i32_0 = arith.constant 0 : i32
    return %c0_i32, %arg1 : i32, i32
  }
  func.func @transform_3(%arg0: i32, %arg1: i32, %arg2: i32) -> (i32, i32) {
    %c0_i32 = arith.constant 0 : i32
    return %arg0, %arg1 : i32, i32
  }
}

module attributes {stable_mosaic.version = 11 : i64} {
  func.func @_flash_attn_kernel(%arg0: i32, %arg1: i32, %arg2: i32, %arg3: memref<1x8x128xf32, #tpu.memory_space<vmem>>, %arg4: memref<1x8x128xf32, #tpu.memory_space<vmem>>, %arg5: memref<1x8x128xf32, #tpu.memory_space<vmem>>, %arg6: memref<1x8x128xf32, #tpu.memory_space<vmem>>, %arg7: memref<2x8x64xf32, #tpu.memory_space<vmem>>, %arg8: memref<2x8x1xf32, #tpu.memory_space<vmem>>, %arg9: memref<2x8x1xf32, #tpu.memory_space<vmem>>, %arg10: memref<2x8x64xf32, #tpu.memory_space<vmem>>) attributes {dimension_semantics = [#tpu.dimension_semantics<parallel>, #tpu.dimension_semantics<parallel>, #tpu.dimension_semantics<arbitrary>], iteration_bounds = array<i64: 2, 1, 1>, scalar_prefetch = 0 : i64, scratch_operands = 4 : i64, tpu.core_type = #tpu.core_type<tc>, window_params = [{transform_indices = @transform_0, window_bounds = array<i64: 1, 8, 128>}, {transform_indices = @transform_1, window_bounds = array<i64: 1, 8, 128>}, {transform_indices = @transform_2, window_bounds = array<i64: 1, 8, 128>}, {transform_indices = @transform_3, window_bounds = array<i64: 1, 8, 128>}]} {
    %c0_i32 = arith.constant 0 : i32
    %0 = arith.cmpi eq, %arg2, %c0_i32 : i32
    %1 = arith.extui %0 : i1 to i32
    %c0_i32_0 = arith.constant 0 : i32
    %2 = arith.cmpi ne, %1, %c0_i32_0 : i32
    scf.if %2 {
      %cst = arith.constant 0xFF800000 : f32
      %9 = vector.broadcast %cst : f32 to vector<2x8x1xf32>
      %c0 = arith.constant 0 : index
      %c0_3 = arith.constant 0 : index
      %c0_4 = arith.constant 0 : index
      %10 = vector.load %arg8[%c0, %c0_3, %c0_4] : memref<2x8x1xf32, #tpu.memory_space<vmem>>, vector<2x8x1xf32>
      tpu.vector_store %arg8[%c0, %c0_3, %c0_4], %9 {strides = array<i32>} : memref<2x8x1xf32, #tpu.memory_space<vmem>>, vector<2x8x1xf32>,
      %cst_5 = arith.constant 0.000000e+00 : f32
      %11 = vector.broadcast %cst_5 : f32 to vector<2x8x1xf32>
      %c0_6 = arith.constant 0 : index
      %c0_7 = arith.constant 0 : index
      %c0_8 = arith.constant 0 : index
      %12 = vector.load %arg9[%c0_6, %c0_7, %c0_8] : memref<2x8x1xf32, #tpu.memory_space<vmem>>, vector<2x8x1xf32>
      tpu.vector_store %arg9[%c0_6, %c0_7, %c0_8], %11 {strides = array<i32>} : memref<2x8x1xf32, #tpu.memory_space<vmem>>, vector<2x8x1xf32>,
      %cst_9 = arith.constant 0.000000e+00 : f32
      %13 = vector.broadcast %cst_9 : f32 to vector<2x8x64xf32>
      %c0_10 = arith.constant 0 : index
      %c0_11 = arith.constant 0 : index
      %c0_12 = arith.constant 0 : index
      %14 = vector.load %arg10[%c0_10, %c0_11, %c0_12] : memref<2x8x64xf32, #tpu.memory_space<vmem>>, vector<2x8x64xf32>
      tpu.vector_store %arg10[%c0_10, %c0_11, %c0_12], %13 {strides = array<i32>} : memref<2x8x64xf32, #tpu.memory_space<vmem>>, vector<2x8x64xf32>,
      %c0_13 = arith.constant 0 : index
      %c0_14 = arith.constant 0 : index
      %c0_15 = arith.constant 0 : index
      %15 = vector.load %arg3[%c0_13, %c0_14, %c0_15] : memref<1x8x128xf32, #tpu.memory_space<vmem>>, vector<1x8x64xf32>
      %16 = vector.shape_cast %15 : vector<1x8x64xf32> to vector<8x64xf32>
      %cst_16 = arith.constant 1.250000e-01 : f32
      %17 = vector.broadcast %cst_16 : f32 to vector<8x64xf32>
      %18 = arith.mulf %16, %17 : vector<8x64xf32>
      %c0_17 = arith.constant 0 : index
      %c0_18 = arith.constant 0 : index
      %c0_19 = arith.constant 0 : index
      %19 = vector.load %arg7[%c0_17, %c0_18, %c0_19] : memref<2x8x64xf32, #tpu.memory_space<vmem>>, vector<1x8x64xf32>
      %20 = vector.shape_cast %19 : vector<1x8x64xf32> to vector<8x64xf32>
      %21 = vector.shape_cast %18 : vector<8x64xf32> to vector<1x8x64xf32>
      tpu.vector_store %arg7[%c0_17, %c0_18, %c0_19], %21 {strides = array<i32>} : memref<2x8x64xf32, #tpu.memory_space<vmem>>, vector<1x8x64xf32>,
      %c0_20 = arith.constant 0 : index
      %c0_21 = arith.constant 0 : index
      %c64 = arith.constant 64 : index
      %22 = vector.load %arg3[%c0_20, %c0_21, %c64] : memref<1x8x128xf32, #tpu.memory_space<vmem>>, vector<1x8x64xf32>
      %23 = vector.shape_cast %22 : vector<1x8x64xf32> to vector<8x64xf32>
      %cst_22 = arith.constant 1.250000e-01 : f32
      %24 = vector.broadcast %cst_22 : f32 to vector<8x64xf32>
      %25 = arith.mulf %23, %24 : vector<8x64xf32>
      %c1 = arith.constant 1 : index
      %c0_23 = arith.constant 0 : index
      %c0_24 = arith.constant 0 : index
      %26 = vector.load %arg7[%c1, %c0_23, %c0_24] : memref<2x8x64xf32, #tpu.memory_space<vmem>>, vector<1x8x64xf32>
      %27 = vector.shape_cast %26 : vector<1x8x64xf32> to vector<8x64xf32>
      %28 = vector.shape_cast %25 : vector<8x64xf32> to vector<1x8x64xf32>
      tpu.vector_store %arg7[%c1, %c0_23, %c0_24], %28 {strides = array<i32>} : memref<2x8x64xf32, #tpu.memory_space<vmem>>, vector<1x8x64xf32>,
    } else {
    }
    %3 = arith.cmpi sle, %arg2, %arg1 : i32
    %4 = arith.extui %3 : i1 to i32
    %c0_i32_1 = arith.constant 0 : i32
    %5 = arith.cmpi ne, %4, %c0_i32_1 : i32
    scf.if %5 {
      %9 = tpu.iota {dimensions = array<i32: 0>} : vector<8x8xi32>
      %10 = tpu.iota {dimensions = array<i32: 1>} : vector<8x8xi32>
      %11 = arith.cmpi slt, %arg2, %arg1 : i32
      %12 = arith.cmpi sle, %10, %9 : vector<8x8xi32>
      %13 = vector.broadcast %11 : i1 to vector<8x8xi1>
      %14 = arith.ori %13, %12 : vector<8x8xi1>
      %c0 = arith.constant 0 : index
      %c0_3 = arith.constant 0 : index
      %c0_4 = arith.constant 0 : index
      %15 = vector.load %arg4[%c0, %c0_3, %c0_4] : memref<1x8x128xf32, #tpu.memory_space<vmem>>, vector<1x8x64xf32>
      %16 = vector.shape_cast %15 : vector<1x8x64xf32> to vector<8x64xf32>
      %c0_5 = arith.constant 0 : index
      %c0_6 = arith.constant 0 : index
      %c0_7 = arith.constant 0 : index
      %17 = vector.load %arg5[%c0_5, %c0_6, %c0_7] : memref<1x8x128xf32, #tpu.memory_space<vmem>>, vector<1x8x64xf32>
      %18 = vector.shape_cast %17 : vector<1x8x64xf32> to vector<8x64xf32>
      %c0_8 = arith.constant 0 : index
      %c0_9 = arith.constant 0 : index
      %c0_10 = arith.constant 0 : index
      %19 = vector.load %arg7[%c0_8, %c0_9, %c0_10] : memref<2x8x64xf32, #tpu.memory_space<vmem>>, vector<1x8x64xf32>
      %20 = vector.shape_cast %19 : vector<1x8x64xf32> to vector<8x64xf32>
      %cst = arith.constant dense<0.000000e+00> : vector<8x8xf32>
      %21 = tpu.matmul %20, %16, %cst {dimension_numbers = #tpu.dot_dimension_numbers<[1], [1], [0], [0], [0, 0, 1, 0], [], []>} : vector<8x64xf32>, vector<8x64xf32>, vector<8x8xf32> -> vector<8x8xf32>
      %cst_11 = arith.constant -1.000000e+30 : f32
      %22 = vector.broadcast %cst_11 : f32 to vector<8x8xf32>
      %23 = arith.select %14, %21, %22 : vector<8x8xi1>, vector<8x8xf32>
      %c0_12 = arith.constant 0 : index
      %c0_13 = arith.constant 0 : index
      %c0_14 = arith.constant 0 : index
      %24 = vector.load %arg8[%c0_12, %c0_13, %c0_14] : memref<2x8x1xf32, #tpu.memory_space<vmem>>, vector<1x8x1xf32>
      %25 = vector.shape_cast %24 : vector<1x8x1xf32> to vector<8x1xf32>
      %cst_15 = arith.constant dense<0xFF800000> : vector<8xf32>
      %26 = vector.multi_reduction <maximumf>, %23, %cst_15 [1] : vector<8x8xf32> to vector<8xf32>
      %27 = vector.shape_cast %26 : vector<8xf32> to vector<8x1xf32>
      %28 = arith.maximumf %25, %27 : vector<8x1xf32>
      %29 = arith.subf %25, %28 : vector<8x1xf32>
      %30 = math.exp %29 : vector<8x1xf32>
      %31 = vector.broadcast %28 : vector<8x1xf32> to vector<8x8xf32>
      %32 = arith.subf %23, %31 : vector<8x8xf32>
      %33 = math.exp %32 : vector<8x8xf32>
      %c0_16 = arith.constant 0 : index
      %c0_17 = arith.constant 0 : index
      %c0_18 = arith.constant 0 : index
      %34 = vector.load %arg9[%c0_16, %c0_17, %c0_18] : memref<2x8x1xf32, #tpu.memory_space<vmem>>, vector<1x8x1xf32>
      %35 = vector.shape_cast %34 : vector<1x8x1xf32> to vector<8x1xf32>
      %36 = arith.mulf %30, %35 : vector<8x1xf32>
      %cst_19 = arith.constant dense<0.000000e+00> : vector<8xf32>
      %37 = vector.multi_reduction <add>, %33, %cst_19 [1] : vector<8x8xf32> to vector<8xf32>
      %38 = vector.shape_cast %37 : vector<8xf32> to vector<8x1xf32>
      %39 = arith.addf %36, %38 : vector<8x1xf32>
      %c0_20 = arith.constant 0 : index
      %c0_21 = arith.constant 0 : index
      %c0_22 = arith.constant 0 : index
      %40 = vector.load %arg9[%c0_20, %c0_21, %c0_22] : memref<2x8x1xf32, #tpu.memory_space<vmem>>, vector<1x8x1xf32>
      %41 = vector.shape_cast %40 : vector<1x8x1xf32> to vector<8x1xf32>
      %42 = vector.shape_cast %39 : vector<8x1xf32> to vector<1x8x1xf32>
      tpu.vector_store %arg9[%c0_20, %c0_21, %c0_22], %42 {strides = array<i32>} : memref<2x8x1xf32, #tpu.memory_space<vmem>>, vector<1x8x1xf32>,
      %c0_23 = arith.constant 0 : index
      %c0_24 = arith.constant 0 : index
      %c0_25 = arith.constant 0 : index
      %43 = vector.load %arg10[%c0_23, %c0_24, %c0_25] : memref<2x8x64xf32, #tpu.memory_space<vmem>>, vector<1x8x64xf32>
      %44 = vector.shape_cast %43 : vector<1x8x64xf32> to vector<8x64xf32>
      %45 = vector.broadcast %30 : vector<8x1xf32> to vector<8x64xf32>
      %46 = arith.mulf %45, %44 : vector<8x64xf32>
      %cst_26 = arith.constant dense<0.000000e+00> : vector<8x64xf32>
      %47 = tpu.matmul %33, %18, %cst_26 {dimension_numbers = #tpu.dot_dimension_numbers<[1], [0], [0], [1], [0, 0, 1, 1], [], []>} : vector<8x8xf32>, vector<8x64xf32>, vector<8x64xf32> -> vector<8x64xf32>
      %48 = arith.addf %46, %47 : vector<8x64xf32>
      %c0_27 = arith.constant 0 : index
      %c0_28 = arith.constant 0 : index
      %c0_29 = arith.constant 0 : index
      %49 = vector.load %arg10[%c0_27, %c0_28, %c0_29] : memref<2x8x64xf32, #tpu.memory_space<vmem>>, vector<1x8x64xf32>
      %50 = vector.shape_cast %49 : vector<1x8x64xf32> to vector<8x64xf32>
      %51 = vector.shape_cast %48 : vector<8x64xf32> to vector<1x8x64xf32>
      tpu.vector_store %arg10[%c0_27, %c0_28, %c0_29], %51 {strides = array<i32>} : memref<2x8x64xf32, #tpu.memory_space<vmem>>, vector<1x8x64xf32>,
      %c0_30 = arith.constant 0 : index
      %c0_31 = arith.constant 0 : index
      %c0_32 = arith.constant 0 : index
      %52 = vector.load %arg8[%c0_30, %c0_31, %c0_32] : memref<2x8x1xf32, #tpu.memory_space<vmem>>, vector<1x8x1xf32>
      %53 = vector.shape_cast %52 : vector<1x8x1xf32> to vector<8x1xf32>
      %54 = vector.shape_cast %28 : vector<8x1xf32> to vector<1x8x1xf32>
      tpu.vector_store %arg8[%c0_30, %c0_31, %c0_32], %54 {strides = array<i32>} : memref<2x8x1xf32, #tpu.memory_space<vmem>>, vector<1x8x1xf32>,
      %c0_33 = arith.constant 0 : index
      %c0_34 = arith.constant 0 : index
      %c64 = arith.constant 64 : index
      %55 = vector.load %arg4[%c0_33, %c0_34, %c64] : memref<1x8x128xf32, #tpu.memory_space<vmem>>, vector<1x8x64xf32>
      %56 = vector.shape_cast %55 : vector<1x8x64xf32> to vector<8x64xf32>
      %c0_35 = arith.constant 0 : index
      %c0_36 = arith.constant 0 : index
      %c64_37 = arith.constant 64 : index
      %57 = vector.load %arg5[%c0_35, %c0_36, %c64_37] : memref<1x8x128xf32, #tpu.memory_space<vmem>>, vector<1x8x64xf32>
      %58 = vector.shape_cast %57 : vector<1x8x64xf32> to vector<8x64xf32>
      %c1 = arith.constant 1 : index
      %c0_38 = arith.constant 0 : index
      %c0_39 = arith.constant 0 : index
      %59 = vector.load %arg7[%c1, %c0_38, %c0_39] : memref<2x8x64xf32, #tpu.memory_space<vmem>>, vector<1x8x64xf32>
      %60 = vector.shape_cast %59 : vector<1x8x64xf32> to vector<8x64xf32>
      %cst_40 = arith.constant dense<0.000000e+00> : vector<8x8xf32>
      %61 = tpu.matmul %60, %56, %cst_40 {dimension_numbers = #tpu.dot_dimension_numbers<[1], [1], [0], [0], [0, 0, 1, 0], [], []>} : vector<8x64xf32>, vector<8x64xf32>, vector<8x8xf32> -> vector<8x8xf32>
      %cst_41 = arith.constant -1.000000e+30 : f32
      %62 = vector.broadcast %cst_41 : f32 to vector<8x8xf32>
      %63 = arith.select %14, %61, %62 : vector<8x8xi1>, vector<8x8xf32>
      %c1_42 = arith.constant 1 : index
      %c0_43 = arith.constant 0 : index
      %c0_44 = arith.constant 0 : index
      %64 = vector.load %arg8[%c1_42, %c0_43, %c0_44] : memref<2x8x1xf32, #tpu.memory_space<vmem>>, vector<1x8x1xf32>
      %65 = vector.shape_cast %64 : vector<1x8x1xf32> to vector<8x1xf32>
      %cst_45 = arith.constant dense<0xFF800000> : vector<8xf32>
      %66 = vector.multi_reduction <maximumf>, %63, %cst_45 [1] : vector<8x8xf32> to vector<8xf32>
      %67 = vector.shape_cast %66 : vector<8xf32> to vector<8x1xf32>
      %68 = arith.maximumf %65, %67 : vector<8x1xf32>
      %69 = arith.subf %65, %68 : vector<8x1xf32>
      %70 = math.exp %69 : vector<8x1xf32>
      %71 = vector.broadcast %68 : vector<8x1xf32> to vector<8x8xf32>
      %72 = arith.subf %63, %71 : vector<8x8xf32>
      %73 = math.exp %72 : vector<8x8xf32>
      %c1_46 = arith.constant 1 : index
      %c0_47 = arith.constant 0 : index
      %c0_48 = arith.constant 0 : index
      %74 = vector.load %arg9[%c1_46, %c0_47, %c0_48] : memref<2x8x1xf32, #tpu.memory_space<vmem>>, vector<1x8x1xf32>
      %75 = vector.shape_cast %74 : vector<1x8x1xf32> to vector<8x1xf32>
      %76 = arith.mulf %70, %75 : vector<8x1xf32>
      %cst_49 = arith.constant dense<0.000000e+00> : vector<8xf32>
      %77 = vector.multi_reduction <add>, %73, %cst_49 [1] : vector<8x8xf32> to vector<8xf32>
      %78 = vector.shape_cast %77 : vector<8xf32> to vector<8x1xf32>
      %79 = arith.addf %76, %78 : vector<8x1xf32>
      %c1_50 = arith.constant 1 : index
      %c0_51 = arith.constant 0 : index
      %c0_52 = arith.constant 0 : index
      %80 = vector.load %arg9[%c1_50, %c0_51, %c0_52] : memref<2x8x1xf32, #tpu.memory_space<vmem>>, vector<1x8x1xf32>
      %81 = vector.shape_cast %80 : vector<1x8x1xf32> to vector<8x1xf32>
      %82 = vector.shape_cast %79 : vector<8x1xf32> to vector<1x8x1xf32>
      tpu.vector_store %arg9[%c1_50, %c0_51, %c0_52], %82 {strides = array<i32>} : memref<2x8x1xf32, #tpu.memory_space<vmem>>, vector<1x8x1xf32>,
      %c1_53 = arith.constant 1 : index
      %c0_54 = arith.constant 0 : index
      %c0_55 = arith.constant 0 : index
      %83 = vector.load %arg10[%c1_53, %c0_54, %c0_55] : memref<2x8x64xf32, #tpu.memory_space<vmem>>, vector<1x8x64xf32>
      %84 = vector.shape_cast %83 : vector<1x8x64xf32> to vector<8x64xf32>
      %85 = vector.broadcast %70 : vector<8x1xf32> to vector<8x64xf32>
      %86 = arith.mulf %85, %84 : vector<8x64xf32>
      %cst_56 = arith.constant dense<0.000000e+00> : vector<8x64xf32>
      %87 = tpu.matmul %73, %58, %cst_56 {dimension_numbers = #tpu.dot_dimension_numbers<[1], [0], [0], [1], [0, 0, 1, 1], [], []>} : vector<8x8xf32>, vector<8x64xf32>, vector<8x64xf32> -> vector<8x64xf32>
      %88 = arith.addf %86, %87 : vector<8x64xf32>
      %c1_57 = arith.constant 1 : index
      %c0_58 = arith.constant 0 : index
      %c0_59 = arith.constant 0 : index
      %89 = vector.load %arg10[%c1_57, %c0_58, %c0_59] : memref<2x8x64xf32, #tpu.memory_space<vmem>>, vector<1x8x64xf32>
      %90 = vector.shape_cast %89 : vector<1x8x64xf32> to vector<8x64xf32>
      %91 = vector.shape_cast %88 : vector<8x64xf32> to vector<1x8x64xf32>
      tpu.vector_store %arg10[%c1_57, %c0_58, %c0_59], %91 {strides = array<i32>} : memref<2x8x64xf32, #tpu.memory_space<vmem>>, vector<1x8x64xf32>,
      %c1_60 = arith.constant 1 : index
      %c0_61 = arith.constant 0 : index
      %c0_62 = arith.constant 0 : index
      %92 = vector.load %arg8[%c1_60, %c0_61, %c0_62] : memref<2x8x1xf32, #tpu.memory_space<vmem>>, vector<1x8x1xf32>
      %93 = vector.shape_cast %92 : vector<1x8x1xf32> to vector<8x1xf32>
      %94 = vector.shape_cast %68 : vector<8x1xf32> to vector<1x8x1xf32>
      tpu.vector_store %arg8[%c1_60, %c0_61, %c0_62], %94 {strides = array<i32>} : memref<2x8x1xf32, #tpu.memory_space<vmem>>, vector<1x8x1xf32>,
    } else {
    }
    %6 = arith.cmpi eq, %arg2, %arg1 : i32
    %7 = arith.extui %6 : i1 to i32
    %c0_i32_2 = arith.constant 0 : i32
    %8 = arith.cmpi ne, %7, %c0_i32_2 : i32
    scf.if %8 {
      %c0 = arith.constant 0 : index
      %c0_3 = arith.constant 0 : index
      %c0_4 = arith.constant 0 : index
      %9 = vector.load %arg9[%c0, %c0_3, %c0_4] : memref<2x8x1xf32, #tpu.memory_space<vmem>>, vector<1x8x1xf32>
      %10 = vector.shape_cast %9 : vector<1x8x1xf32> to vector<8x1xf32>
      %cst = arith.constant 1.000000e+00 : f32
      %11 = vector.broadcast %cst : f32 to vector<8x1xf32>
      %12 = arith.divf %11, %10 : vector<8x1xf32>
      %c0_5 = arith.constant 0 : index
      %c0_6 = arith.constant 0 : index
      %c0_7 = arith.constant 0 : index
      %13 = vector.load %arg10[%c0_5, %c0_6, %c0_7] : memref<2x8x64xf32, #tpu.memory_space<vmem>>, vector<1x8x64xf32>
      %14 = vector.shape_cast %13 : vector<1x8x64xf32> to vector<8x64xf32>
      %15 = vector.broadcast %12 : vector<8x1xf32> to vector<8x64xf32>
      %16 = arith.mulf %14, %15 : vector<8x64xf32>
      %c1 = arith.constant 1 : index
      %c0_8 = arith.constant 0 : index
      %c0_9 = arith.constant 0 : index
      %17 = vector.load %arg9[%c1, %c0_8, %c0_9] : memref<2x8x1xf32, #tpu.memory_space<vmem>>, vector<1x8x1xf32>
      %18 = vector.shape_cast %17 : vector<1x8x1xf32> to vector<8x1xf32>
      %cst_10 = arith.constant 1.000000e+00 : f32
      %19 = vector.broadcast %cst_10 : f32 to vector<8x1xf32>
      %20 = arith.divf %19, %18 : vector<8x1xf32>
      %c1_11 = arith.constant 1 : index
      %c0_12 = arith.constant 0 : index
      %c0_13 = arith.constant 0 : index
      %21 = vector.load %arg10[%c1_11, %c0_12, %c0_13] : memref<2x8x64xf32, #tpu.memory_space<vmem>>, vector<1x8x64xf32>
      %22 = vector.shape_cast %21 : vector<1x8x64xf32> to vector<8x64xf32>
      %23 = vector.broadcast %20 : vector<8x1xf32> to vector<8x64xf32>
      %24 = arith.mulf %22, %23 : vector<8x64xf32>
      %25 = tpu.concatenate %16, %24 in 1 : vector<8x64xf32>, vector<8x64xf32> -> vector<8x128xf32>
      %c0_14 = arith.constant 0 : index
      %c0_15 = arith.constant 0 : index
      %c0_16 = arith.constant 0 : index
      %26 = vector.load %arg6[%c0_14, %c0_15, %c0_16] : memref<1x8x128xf32, #tpu.memory_space<vmem>>, vector<1x8x128xf32>
      %27 = vector.shape_cast %26 : vector<1x8x128xf32> to vector<8x128xf32>
      %28 = vector.shape_cast %25 : vector<8x128xf32> to vector<1x8x128xf32>
      tpu.vector_store %arg6[%c0_14, %c0_15, %c0_16], %28 {strides = array<i32>} : memref<1x8x128xf32, #tpu.memory_space<vmem>>, vector<1x8x128xf32>,
    } else {
    }
    return
  }
  func.func @transform_0(%arg0: i32, %arg1: i32, %arg2: i32) -> (i32, i32, i32) {
    %c0_i32 = arith.constant 0 : i32
    %c0_i32_0 = arith.constant 0 : i32
    return %arg0, %arg1, %c0_i32 : i32, i32, i32
  }
  func.func @transform_1(%arg0: i32, %arg1: i32, %arg2: i32) -> (i32, i32, i32) {
    %0 = arith.minsi %arg2, %arg1 : i32
    %c1_i32 = arith.constant 1 : i32
    %c0_i32 = arith.constant 0 : i32
    return %arg0, %0, %c1_i32 : i32, i32, i32
  }
  func.func @transform_2(%arg0: i32, %arg1: i32, %arg2: i32) -> (i32, i32, i32) {
    %0 = arith.minsi %arg2, %arg1 : i32
    %c2_i32 = arith.constant 2 : i32
    %c0_i32 = arith.constant 0 : i32
    return %arg0, %0, %c2_i32 : i32, i32, i32
  }
  func.func @transform_3(%arg0: i32, %arg1: i32, %arg2: i32) -> (i32, i32, i32) {
    %c0_i32 = arith.constant 0 : i32
    %c0_i32_0 = arith.constant 0 : i32
    return %arg0, %arg1, %c0_i32 : i32, i32, i32
  }
}

</mosaic_0001>

<bundles_post_ra>
// kernel: causal_self_attention.5
= control target key start
LH: loop header
LB: loop body
LE: loop exit
PB: predicated region body
PF: predicated region fallthrough
CT: control target
= control target key end

     0   :  { %s314_s0 = inlined_call_operand.vmem [shape: f32[16,128], index: 0, kind: input, shape index: {}]   ;;  %s315_s1 = inlined_call_operand.vmem [shape: f32[128,128], index: 1, kind: input, shape index: {}]   ;;  %s316_s2 = inlined_call_operand.vmem [shape: f32[1,128], index: 2, kind: input, shape index: {}]   ;;  %s317_s3 = inlined_call_operand.hbm [shape: f32[16,128], index: 3, kind: output, shape index: {}]  }
   0x1   :  { %v40_v0 = vld [vmem:[%s315_s1 + $0x78] sm:$0xff]  ;;  %v39_v1 = vld [vmem:[%s315_s1 + $0x70] sm:$0xff]  ;;  %v38_v2 = vld [vmem:[%s315_s1 + $0x68] sm:$0xff] }
   0x2   :  { %171 = vmatprep.subr.mxu0 %v40_v0  ;;  %v37_v3 = vld [vmem:[%s315_s1 + $0x60] sm:$0xff]  ;;  %v36_v5 = vld [vmem:[%s315_s1 + $0x58] sm:$0xff] }
   0x3   :  { %172 = vmatpush3.msra.mxu0 %v40_v0  ;;  %v23_v4 = vld [vmem:[%s314_s0] sm:$0xff] }
   0x4   :  { %173 = vmatprep.subr.mxu0 %v39_v1  ;;  %203 = vmatprep.mubr.f32.mxu0 %v23_v4 }
   0x5   :  { %174 = vmatpush3.msra.mxu0 %v39_v1 }
   0x6   :  { %175 = vmatprep.subr.mxu0 %v38_v2 }
   0x7   :  { %176 = vmatpush3.msra.mxu0 %v38_v2 }
   0x8   :  { %8 = vsyncpa [#allocation4], 0  ;;  %177 = vmatprep.subr.mxu0 %v37_v3  ;;  %v35_v6 = vld [vmem:[%s315_s1 + $0x50] sm:$0xff]  ;;  %v34_v7 = vld [vmem:[%s315_s1 + $0x48] sm:$0xff]  ;;  %s231_s23 = smov [#allocation3]  }
   0x9   :  { %178 = vmatpush3.msra.mxu0 %v37_v3  ;;  %v33_v8 = vld [vmem:[%s315_s1 + $0x40] sm:$0xff]  ;;  %v32_v9 = vld [vmem:[%s315_s1 + $0x38] sm:$0xff]  ;;  %v31_v10 = vld [vmem:[%s315_s1 + $0x30] sm:$0xff]  ;;  %s141_s24 = sshll.u32 %s231_s23, 4  ;;  %s142_s24 = int_to_ptr.vmem [resolvable:$true] %s141_s24 }
   0xa   :  { %179 = vmatprep.subr.mxu0 %v36_v5  ;;  %v30_v11 = vld [vmem:[%s315_s1 + $0x28] sm:$0xff]  ;;  %v29_v12 = vld [vmem:[%s315_s1 + $0x20] sm:$0xff]  ;;  %v28_v13 = vld [vmem:[%s315_s1 + $0x18] sm:$0xff]  ;;  %p214_p1 = scmp.lt.s32.totalorder %s142_s24, %s142_s24 }
   0xb   :  { %180 = vmatpush3.msra.mxu0 %v36_v5  ;;  %v27_v14 = vld [vmem:[%s315_s1 + $0x10] sm:$0xff]  ;;  %v26_v15 = vld [vmem:[%s315_s1 + $0x8] sm:$0xff]  ;;  %v25_v16 = vld [vmem:[%s315_s1] sm:$0xff]  ;;  %s209_s1 = scalar_lea.vmem %s142_s24, 256 }
   0xc   :  { %181 = vmatprep.subr.mxu0 %v35_v6  ;;  %v24_v17 = vld [vmem:[%s314_s0 + $0x8] sm:$0xff]  ;;  %v152_v18 = vld [vmem:[%s316_s2] ss:$0 sm:$0xff]  ;;  %p210_p0 = scmp.ne.s32.totalorder %s142_s24, %s209_s1  ;;  %p215_p2 = scmp.lt.s32.totalorder %s209_s1, %s209_s1 }
   0xd   :  { %182 = vmatpush3.msra.mxu0 %v35_v6 }
   0xe   :  { %183 = vmatprep.subr.mxu0 %v34_v7  ;;  %p216_p3 = por %p215_p2, %p214_p1 }
   0xf   :  { %184 = vmatpush3.msra.mxu0 %v34_v7 }
  0x10   :  { %185 = vmatprep.subr.mxu0 %v33_v8  ;;  %p217_p4 = pnand %p216_p3, %p210_p0 }
  0x11   :  { %186 = vmatpush3.msra.mxu0 %v33_v8 }
  0x12   :  { %187 = vmatprep.subr.mxu0 %v32_v9 }
  0x13   :  { %188 = vmatpush3.msra.mxu0 %v32_v9 }
  0x14   :  { %189 = vmatprep.subr.mxu0 %v31_v10 }
  0x15   :  { %190 = vmatpush3.msra.mxu0 %v31_v10 }
  0x16   :  { %191 = vmatprep.subr.mxu0 %v30_v11 }
  0x17   :  { %192 = vmatpush3.msra.mxu0 %v30_v11 }
  0x18   :  { %193 = vmatprep.subr.mxu0 %v29_v12 }
  0x19   :  { %194 = vmatpush3.msra.mxu0 %v29_v12 }
  0x1a   :  { %195 = vmatprep.subr.mxu0 %v28_v13 }
  0x1b   :  { %196 = vmatpush3.msra.mxu0 %v28_v13 }
  0x1c   :  { %197 = vmatprep.subr.mxu0 %v27_v14 }
  0x1d   :  { %198 = vmatpush3.msra.mxu0 %v27_v14 }
  0x1e   :  { %199 = vmatprep.subr.mxu0 %v26_v15 }
  0x1f   :  { %200 = vmatpush3.msra.mxu0 %v26_v15 }
  0x20   :  { %201 = vmatprep.subr.mxu0 %v25_v16 }
  0x21   :  { %202 = vmatpush3.msra.mxu0 %v25_v16 }
  0x22   :  { %204 = vmatmul.mubr.f32.vlgmr.msra.gmra.mxu0 %v24_v17 }
  0xe2   :  { %v205_v19 = vpop.f32.mrf.mxu0 }
  0xe3   :  { %v133_v20 = vadd.f32 %v205_v19, %v152_v18 }
  0xe4   :  { %v107_v21 = vpop.f32.mrf.mxu0 }
  0xe5   :  { %135 = vst [vmem:[#allocation3 + $0x8] sm:$0xff] %v133_v20  ;;  %v132_v22 = vadd.f32 %v152_v18, %v107_v21 }
  0xe7   :  { %134 = vst [vmem:[#allocation3] sm:$0xff] %v132_v22 }
  0xe8   :  { %220 = shalt.err (!%p217_p4)
}
  0xe9   :  { %s232_s0 = smov 128   ;;  %s233_s25 = smov 8  }
  0xea   :  { %147 = dma.vmem_to_hbm [thread:$0]  %s142_s24, 256, %s317_s3, [#allocation4], %s232_s0, %s232_s0, %s233_s25  }
  0xeb   :  { %229 = dma.done.wait [#allocation4], 256  }
  0xec   :  { %230 = vsyncadd [#allocation4], 4294967040 }
  0xed   :  { %151 = vsyncpa [#allocation4], 1 }

// kernel: causal_self_attention.3
= control target key start
LH: loop header
LB: loop body
LE: loop exit
PB: predicated region body
PF: predicated region fallthrough
CT: control target
= control target key end

     0   :  { %8 = vsyncpa [#allocation4], 0  ;;  %s476_s0 = inlined_call_operand.hbm [shape: f32[16,128], index: 0, kind: input, shape index: {}]   ;;  %s477_s1 = inlined_call_operand.hbm [shape: f32[128,384], index: 1, kind: input, shape index: {}]   ;;  %s478_s2 = inlined_call_operand.vmem [shape: f32[1,384], index: 2, kind: input, shape index: {}]   ;;  %s479_s3 = inlined_call_operand.vmem [shape: f32[16,384], index: 3, kind: output, shape index: {}]  }
   0x1   :  { %9 = vsyncpa [#allocation6], 0  ;;  %s420_s12 = smov [#allocation3]  }
   0x2   :  { %s15_s13 = sshll.u32 %s420_s12, 4  ;;  %s16_s13 = int_to_ptr.vmem [resolvable:$true] %s15_s13 }
   0x3   :  { %s384_s14 = scalar_lea.vmem %s16_s13, 256  ;;  %p389_p1 = scmp.lt.s32.totalorder %s16_s13, %s16_s13 }
   0x4   :  { %p385_p0 = scmp.ne.s32.totalorder %s16_s13, %s384_s14  ;;  %p390_p2 = scmp.lt.s32.totalorder %s384_s14, %s384_s14 }
   0x6   :  { %p391_p3 = por %p390_p2, %p389_p1 }
   0x8   :  { %p392_p4 = pnand %p391_p3, %p385_p0 }
   0xa   :  { %395 = shalt.err (!%p392_p4)
}
   0xb   :  { %s421_s15 = smov 128   ;;  %s422_s16 = smov 8  }
   0xc   :  { %21 = dma.hbm_to_vmem [thread:$0]  %s476_s0, 256, %s16_s13, [#allocation4], %s421_s15, %s421_s15, %s422_s16  }
   0xd   :  { %s423_s19 = smov [#allocation5]  }
   0xe   :  { %s27_s20 = sshll.u32 %s423_s19, 4  ;;  %s28_s20 = int_to_ptr.vmem [resolvable:$true] %s27_s20 }
   0xf   :  { %s404_s21 = scalar_lea.vmem %s28_s20, 6144  ;;  %p409_p6 = scmp.lt.s32.totalorder %s28_s20, %s28_s20 }
  0x10   :  { %p405_p5 = scmp.ne.s32.totalorder %s28_s20, %s404_s21  ;;  %p410_p7 = scmp.lt.s32.totalorder %s404_s21, %s404_s21 }
  0x12   :  { %p411_p8 = por %p410_p7, %p409_p6 }
  0x14   :  { %p412_p9 = pnand %p411_p8, %p405_p5 }
  0x16   :  { %415 = shalt.err (!%p412_p9)
}
  0x17   :  { %s424_s22 = smov 384   ;;  %s425_s23 = smov 24  }
  0x18   :  { %33 = dma.hbm_to_vmem [thread:$0]  %s477_s1, 6144, %s28_s20, [#allocation6], %s424_s22, %s424_s22, %s425_s23  }
  0x19   :  { %416 = dma.done.wait [#allocation4], 256  }
  0x1a   :  { %417 = vsyncadd [#allocation4], 4294967040 }
  0x1b   :  { %418 = dma.done.wait [#allocation6], 6144  }
  0x1c   :  { %419 = vsyncadd [#allocation6], 4294961152  ;;  %v426_v0 = vmov 0.0   ;;  %v106_v1 = vld [vmem:[#allocation5 + $0x170] sm:$0xff]  ;;  %v105_v2 = vld [vmem:[#allocation5 + $0x168] sm:$0xff]  ;;  %v283_v51 = vlaneseq }
  0x1d   :  { %172 = vmatprep.mubr.f32.mxu0 %v426_v0  ;;  %v103_v3 = vld [vmem:[#allocation5 + $0x158] sm:$0xff]  ;;  %108 = vmatprep.subr.mxu0 %v106_v1  ;;  %v102_v5 = vld [vmem:[#allocation5 + $0x150] sm:$0xff]  ;;  %v100_v6 = vld [vmem:[#allocation5 + $0x140] sm:$0xff] }
  0x1e   :  { %v107_v4 = vld [vmem:[#allocation5 + $0x178] sm:$0xff]  ;;  %109 = vmatpush1.msra.mxu0 %v105_v2  ;;  %v104_v7 = vld [vmem:[#allocation5 + $0x160] sm:$0xff]  ;;  %v101_v9 = vld [vmem:[#allocation5 + $0x148] sm:$0xff]  ;;  %v284_v52 = vshrl.u32 %v283_v51, 7 }
  0x1f   :  { %334 = vmatprep.subr.mxu1 %v107_v4  ;;  %110 = vmatprep.subr.mxu0 %v103_v3  ;;  %v99_v8 = vld [vmem:[#allocation5 + $0x138] sm:$0xff]  ;;  %v97_v10 = vld [vmem:[#allocation5 + $0x128] sm:$0xff]  ;;  %v96_v11 = vld [vmem:[#allocation5 + $0x120] sm:$0xff] }
  0x20   :  { %335 = vmatpush3.msra.mxu1 %v107_v4  ;;  %111 = vmatpush1.msra.mxu0 %v102_v5  ;;  %v98_v12 = vld [vmem:[#allocation5 + $0x130] sm:$0xff]  ;;  %v93_v14 = vld [vmem:[#allocation5 + $0x108] sm:$0xff]  ;;  %v95_v15 = vld [vmem:[#allocation5 + $0x118] sm:$0xff]  ;;  %v285_v53 = vsub.s32 0, %v284_v52  ;;  %v289_v55 = vsub.s32 1, %v284_v52  ;;  %v293_v56 = vsub.s32 2, %v284_v52 }
  0x21   :  { %336 = vmatprep.subr.mxu1 %v104_v7  ;;  %112 = vmatprep.subr.mxu0 %v100_v6  ;;  %v94_v13 = vld [vmem:[#allocation5 + $0x110] sm:$0xff]  ;;  %v91_v16 = vld [vmem:[#allocation5 + $0xf8] sm:$0xff]  ;;  %v92_v18 = vld [vmem:[#allocation5 + $0x100] sm:$0xff] }
  0x22   :  { %337 = vmatpush3.msra.mxu1 %v104_v7  ;;  %113 = vmatpush1.msra.mxu0 %v99_v8  ;;  %v90_v17 = vld [vmem:[#allocation5 + $0xf0] sm:$0xff]  ;;  %v88_v19 = vld [vmem:[#allocation5 + $0xe0] sm:$0xff]  ;;  %v87_v20 = vld [vmem:[#allocation5 + $0xd8] sm:$0xff] }
  0x23   :  { %338 = vmatprep.subr.mxu1 %v101_v9  ;;  %114 = vmatprep.subr.mxu0 %v97_v10  ;;  %v89_v21 = vld [vmem:[#allocation5 + $0xe8] sm:$0xff]  ;;  %v84_v23 = vld [vmem:[#allocation5 + $0xc0] sm:$0xff]  ;;  %v86_v24 = vld [vmem:[#allocation5 + $0xd0] sm:$0xff] }
  0x24   :  { %339 = vmatpush3.msra.mxu1 %v101_v9  ;;  %115 = vmatpush1.msra.mxu0 %v96_v11  ;;  %v85_v22 = vld [vmem:[#allocation5 + $0xc8] sm:$0xff]  ;;  %v82_v25 = vld [vmem:[#allocation5 + $0xb0] sm:$0xff]  ;;  %v83_v27 = vld [vmem:[#allocation5 + $0xb8] sm:$0xff] }
  0x25   :  { %340 = vmatprep.subr.mxu1 %v98_v12  ;;  %116 = vmatprep.subr.mxu0 %v94_v13  ;;  %v81_v26 = vld [vmem:[#allocation5 + $0xa8] sm:$0xff]  ;;  %v79_v28 = vld [vmem:[#allocation5 + $0x98] sm:$0xff]  ;;  %v78_v29 = vld [vmem:[#allocation5 + $0x90] sm:$0xff] }
  0x26   :  { %341 = vmatpush3.msra.mxu1 %v98_v12  ;;  %117 = vmatpush1.msra.mxu0 %v93_v14  ;;  %v80_v30 = vld [vmem:[#allocation5 + $0xa0] sm:$0xff]  ;;  %v75_v32 = vld [vmem:[#allocation5 + $0x78] sm:$0xff]  ;;  %v77_v33 = vld [vmem:[#allocation5 + $0x88] sm:$0xff] }
  0x27   :  { %342 = vmatprep.subr.mxu1 %v95_v15  ;;  %118 = vmatprep.subr.mxu0 %v91_v16  ;;  %v76_v31 = vld [vmem:[#allocation5 + $0x80] sm:$0xff]  ;;  %v73_v34 = vld [vmem:[#allocation5 + $0x68] sm:$0xff]  ;;  %v74_v36 = vld [vmem:[#allocation5 + $0x70] sm:$0xff] }
  0x28   :  { %343 = vmatpush3.msra.mxu1 %v95_v15  ;;  %119 = vmatpush1.msra.mxu0 %v90_v17  ;;  %v72_v35 = vld [vmem:[#allocation5 + $0x60] sm:$0xff]  ;;  %v70_v37 = vld [vmem:[#allocation5 + $0x50] sm:$0xff]  ;;  %v69_v38 = vld [vmem:[#allocation5 + $0x48] sm:$0xff] }
  0x29   :  { %344 = vmatprep.subr.mxu1 %v92_v18  ;;  %120 = vmatprep.subr.mxu0 %v88_v19  ;;  %v71_v39 = vld [vmem:[#allocation5 + $0x58] sm:$0xff]  ;;  %v66_v41 = vld [vmem:[#allocation5 + $0x30] sm:$0xff]  ;;  %v68_v42 = vld [vmem:[#allocation5 + $0x40] sm:$0xff] }
  0x2a   :  { %345 = vmatpush3.msra.mxu1 %v92_v18  ;;  %121 = vmatpush1.msra.mxu0 %v87_v20  ;;  %v67_v40 = vld [vmem:[#allocation5 + $0x38] sm:$0xff]  ;;  %v64_v43 = vld [vmem:[#allocation5 + $0x20] sm:$0xff]  ;;  %v65_v45 = vld [vmem:[#allocation5 + $0x28] sm:$0xff] }
  0x2b   :  { %346 = vmatprep.subr.mxu1 %v89_v21  ;;  %122 = vmatprep.subr.mxu0 %v85_v22  ;;  %v63_v44 = vld [vmem:[#allocation5 + $0x18] sm:$0xff]  ;;  %v61_v46 = vld [vmem:[#allocation5 + $0x8] sm:$0xff]  ;;  %v60_v47 = vld [vmem:[#allocation5] sm:$0xff] }
  0x2c   :  { %347 = vmatpush3.msra.mxu1 %v89_v21  ;;  %123 = vmatpush1.msra.mxu0 %v84_v23  ;;  %v62_v48 = vld [vmem:[#allocation5 + $0x10] sm:$0xff]  ;;  %v59_v50 = vld [vmem:[#allocation3 + $0x8] sm:$0xff] }
  0x2d   :  { %348 = vmatprep.subr.mxu1 %v86_v24  ;;  %124 = vmatprep.subr.mxu0 %v82_v25  ;;  %v58_v49 = vld [vmem:[#allocation3] sm:$0xff] }
  0x2e   :  { %349 = vmatpush3.msra.mxu1 %v86_v24  ;;  %125 = vmatpush1.msra.mxu0 %v81_v26  ;;  %v281_v54 = vld [vmem:[%s478_s2] sm:$0x7] }
  0x2f   :  { %350 = vmatprep.subr.mxu1 %v83_v27  ;;  %126 = vmatprep.subr.mxu0 %v79_v28  ;;  %v286_v57 = vrot.slane %v281_v54, %v285_v53  ;;  %v290_v58 = vrot.slane %v281_v54, %v289_v55  ;;  %v294_v59 = vrot.slane %v281_v54, %v293_v56 }
  0x30   :  { %351 = vmatpush3.msra.mxu1 %v83_v27  ;;  %127 = vmatpush1.msra.mxu0 %v78_v29 }
  0x31   :  { %352 = vmatprep.subr.mxu1 %v80_v30  ;;  %128 = vmatprep.subr.mxu0 %v76_v31 }
  0x32   :  { %353 = vmatpush3.msra.mxu1 %v80_v30  ;;  %129 = vmatpush1.msra.mxu0 %v75_v32 }
  0x33   :  { %354 = vmatprep.subr.mxu1 %v77_v33  ;;  %130 = vmatprep.subr.mxu0 %v73_v34 }
  0x34   :  { %355 = vmatpush3.msra.mxu1 %v77_v33  ;;  %131 = vmatpush1.msra.mxu0 %v72_v35 }
  0x35   :  { %356 = vmatprep.subr.mxu1 %v74_v36  ;;  %132 = vmatprep.subr.mxu0 %v70_v37 }
  0x36   :  { %357 = vmatpush3.msra.mxu1 %v74_v36  ;;  %133 = vmatpush1.msra.mxu0 %v69_v38 }
  0x37   :  { %358 = vmatprep.subr.mxu1 %v71_v39  ;;  %134 = vmatprep.subr.mxu0 %v67_v40 }
  0x38   :  { %359 = vmatpush3.msra.mxu1 %v71_v39  ;;  %135 = vmatpush1.msra.mxu0 %v66_v41 }
  0x39   :  { %360 = vmatprep.subr.mxu1 %v68_v42  ;;  %136 = vmatprep.subr.mxu0 %v64_v43 }
  0x3a   :  { %361 = vmatpush3.msra.mxu1 %v68_v42  ;;  %137 = vmatpush1.msra.mxu0 %v63_v44 }
  0x3b   :  { %362 = vmatprep.subr.mxu1 %v65_v45  ;;  %138 = vmatprep.subr.mxu0 %v61_v46 }
  0x3c   :  { %363 = vmatpush3.msra.mxu1 %v65_v45  ;;  %139 = vmatpush1.msra.mxu0 %v60_v47 }
  0x3d   :  { %364 = vmatprep.subr.mxu1 %v62_v48  ;;  %173 = vmatmul.mubr.f32.vlgmr.msra.gmra.mxu0 %v58_v49 }
  0x3e   :  { %365 = vmatpush3.msra.mxu1 %v62_v48  ;;  %366 = vmatprep.mubr.f32.mxu1 %v58_v49 }
  0x3f   :  { %178 = vmatprep.mubr.f32.mxu0 %v426_v0  ;;  %367 = vmatmul.mubr.f32.vlgmr.msra.gmra.mxu1 %v59_v50 }
  0x41   :  { %179 = vmatmul.mubr.f32.gmra.mxu0 %v59_v50 }
  0xfd   :  { %v174_v60 = vpop.f32.mrf.mxu0 }
  0xfe   :  { %v298_v61 = vadd.f32 %v286_v57, %v174_v60 }
  0xff   :  { %v176_v62 = vpop.f32.mrf.mxu0  ;;  %v368_v63 = vpop.f32.mrf.mxu1 }
 0x100   :  { %304 = vst [vmem:[%s479_s3] sm:$0xff] %v298_v61  ;;  %v299_v0 = vadd.f32 %v290_v58, %v176_v62  ;;  %v303_v1 = vadd.f32 %v368_v63, %v294_v59 }
 0x101   :  { %v180_v2 = vpop.f32.mrf.mxu0  ;;  %v251_v3 = vpop.f32.mrf.mxu1 }
 0x102   :  { %305 = vst [vmem:[%s479_s3 + $0x8] sm:$0xff] %v299_v0  ;;  %309 = vst [vmem:[%s479_s3 + $0x28] sm:$0xff] %v303_v1  ;;  %v301_v4 = vadd.f32 %v286_v57, %v180_v2  ;;  %v300_v5 = vadd.f32 %v294_v59, %v251_v3 }
 0x103   :  { %v182_v6 = vpop.f32.mrf.mxu0 }
 0x104   :  { %307 = vst [vmem:[%s479_s3 + $0x18] sm:$0xff] %v301_v4  ;;  %306 = vst [vmem:[%s479_s3 + $0x10] sm:$0xff] %v300_v5  ;;  %v302_v7 = vadd.f32 %v290_v58, %v182_v6 }
 0x106   :  { %308 = vst [vmem:[%s479_s3 + $0x20] sm:$0xff] %v302_v7 }
 0x107   :  { %314 = vsyncpa [#allocation4], 1 }
 0x108   :  { %315 = vsyncpa [#allocation6], 1 }

// kernel: causal_self_attention.4
= control target key start
LH: loop header
LB: loop body
LE: loop exit
PB: predicated region body
PF: predicated region fallthrough
CT: control target
= control target key end

     0   :  { %s1040_s12 = smov 0   ;;  %s1042_s13 = smov 0   ;;  %s1135_s0 = inlined_call_operand.vmem [shape: f32[2,8,384], index: 0, kind: input, shape index: {}, may-alias: {0,1,2}]   ;;  %s1136_s1 = inlined_call_operand.vmem [shape: f32[2,8,384], index: 1, kind: input, shape index: {}, may-alias: {0,1,2}]   ;;  %s1137_s2 = inlined_call_operand.vmem [shape: f32[2,8,384], index: 2, kind: input, shape index: {}, may-alias: {0,1,2}]   ;;  %s1138_s3 = inlined_call_operand.vmem [shape: f32[2,8,128], index: 3, kind: output, shape index: {}]  }
   0x1   :  { %s1044_s14 = smov 0  }
   0x2 LB: > { %s32_s15 = sadd.s32 1, %s1009_s13  ;;  %p902_p0 = scmp.ge.s32.totalorder %s1013_s14, 1  ;;  %s1013_s14 = sphi %s1044_s14, %s13_s14   ;;  %s1009_s13 = sphi %s1042_s13, %s1140_s13   ;;  %s1005_s12 = sphi %s1040_s12, %s1139_s12  }
   0x3   : > { %p34_p1 = scmp.ge.s32.totalorder %s32_s15, 2  ;;  %p214_p2 = scmp.lt.s32.totalorder %s1013_s14, 3 }
   0x5   : > { %s1142_s15 = smov (%p34_p1, %s32_s15), 0  ;;  %p215_p3 = pnand %p902_p0, %p214_p2 }
   0x6   : > { %p268_p4 = scmp.lt.s32.totalorder (!%p215_p3), %s1005_s12, 1  ;;  %s1019_s23 = smov (!%p215_p3), 64  }
   0x7   : > { %218 = sbr.rel (%p215_p3) target bundleno = 1391 (0x56f), region = 32 }
   0xc   : > { %vm321_vm0 = vcmask 523264   ;;  %v1015_v0 = vmov 0.0   ;;  %vm1016_vm1 = vmmov 0   ;;  %s1144_s12 = smov (!%p268_p4, %s1005_s12), 1  ;;  %vm316_vm2 = vcmask 7168  }
   0xd   : > { %927 = vmatprep.subr.mxu0 %v1015_v0  ;;  %322 = vst.msk [vmem:[#allocation5] sm:$0xff] %vm321_vm0, %v1015_v0  ;;  %323 = vst.msk [vmem:[#allocation5 + $0x8] sm:$0xff] %vm321_vm0, %v1015_v0  ;;  %929 = vmatprep.mubr.msk.f32.mxu0 %vm1016_vm1, %v1015_v0  ;;  %s1071_s16 = smul.u32 24, %s1144_s12  ;;  %v1017_v5 = vmov -inf   ;;  %v339_v6 = vlaneseq  ;;  %vm431_vm4 = vcmask 64512   ;;  %v1018_v13 = vmov 0  }
   0xe   : > { %932 = vmatprep.subr.mxu1 %v1015_v0  ;;  %934 = vmatprep.mubr.msk.f32.mxu1 %vm1016_vm1, %v1015_v0  ;;  %317 = vst.msk [vmem:[#allocation3] sm:$0xff] %vm316_vm2, %v1017_v5  ;;  %318 = vst.msk [vmem:[#allocation3 + $0x8] sm:$0xff] %vm316_vm2, %v1017_v5  ;;  %s906_s27 = sshll.u32 %s1144_s12, 3 }
   0xf   : > { %s276_s19 = scalar_lea.vmem %s1135_s0, %s1071_s16  ;;  %s838_s22 = scalar_lea.vmem %s1136_s1, %s1071_s16  ;;  %319 = vst.msk [vmem:[#allocation4] sm:$0xff] %vm316_vm2, %v1015_v0  ;;  %320 = vst.msk [vmem:[#allocation4 + $0x8] sm:$0xff] %vm316_vm2, %v1015_v0  ;;  %v340_v7 = vshrl.u32 %v339_v6, 7  ;;  %v342_v8 = vand.u32 127, %v339_v6  ;;  %977 = vset.pattern.permute.xlu0 %v1018_v13  ;;  %978 = vset.pattern.permute.xlu1 %v1018_v13 }
  0x10   : > { %v324_v1 = vld [vmem:[%s276_s19] sm:$0xff]  ;;  %v907_v2 = vld [vmem:[%s838_s22 + $0x8] sm:$0xff]  ;;  %s844_s26 = scalar_lea.vmem %s1137_s2, %s1071_s16  ;;  %s311_s30 = scalar_lea.vmem %s1138_s3, %s906_s27 }
  0x11   : > { %v325_v3 = vmul.f32 0.125, %v324_v1  ;;  %928 = vmatpush3.xpose.msk.msra.mxu0 %vm321_vm0, %v907_v2  ;;  %vm344_vm3 = vcmp.le.s32.totalorder %v342_v8, %v340_v7  ;;  %v908_v19 = vld [vmem:[%s844_s26 + $0x10] sm:$0xff] }
  0x12   : > { %942 = vmatprep.subr.mxu0 %v1015_v0  ;;  %933 = vmatpush3.msra.mxu1 %v908_v19 }
  0x13   : > { %326 = vst.msk [vmem:[#allocation2] sm:$0xff] %vm321_vm0, %v325_v3  ;;  %330 = vrot.lane.b32.xlu1 %v325_v3, %s1019_s23  ;;  %937 = vmatprep.subr.mxu1 %v1015_v0 }
  0x14   : > { %v455_v58 = vld [vmem:[#allocation5] sm:$0xff] }
  0x15   : > { %v430_v14 = vld [vmem:[#allocation3] sm:$0xff]  ;;  %v622_v32 = vld [vmem:[#allocation3 + $0x8] sm:$0xff] }
  0x16   : > { %v447_v47 = vld [vmem:[#allocation4] sm:$0xff]  ;;  %v639_v53 = vld [vmem:[#allocation4 + $0x8] sm:$0xff] }
  0x17   : > { %543 = vrot.lane.b32.xlu1 %v907_v2, %s1019_s23 }
  0x1a   : > { %v351_v4 = vld [vmem:[#allocation2] sm:$0xff] }
  0x1b   : > { %930 = vmatmul.mubr.msk.f32.vlgmr.msra.gmra.mxu0 %vm321_vm0, %v351_v4 }
  0x1c   : > { %944 = vmatprep.mubr.msk.f32.mxu0 %vm1016_vm1, %v1015_v0 }
  0x85   : > { %v331_v18 = vpop.permute.xlu1 %330 }
  0x86   : > { %334 = vst.msk [vmem:[#allocation2 + $0x8] sm:$0xff] %vm321_vm0, %v331_v18 }
  0x89   : > { %v544_v23 = vpop.permute.xlu1 %543 }
  0x8d   : > { %v541_v25 = vld [vmem:[#allocation2 + $0x8] sm:$0xff] }
  0xdb   : > { %v425_v9 = vpop.f32.mrf.mxu0 }
  0xdc   : > { %v429_v10 = vsel %vm344_vm3, %v425_v9, -1e+30 }
  0xdd   : > { %v931_v11 = vpop.f32.mrf.mxu0  ;;  %v432_v12 = vsel %vm431_vm4, %v429_v10, -inf }
  0xde   : > { %433 = vmax.xlane.f32.xlu0 %v432_v12 }
 0x167   : > { %v434_v15 = vpop.xlane.xlu0 %433 }
 0x168   : > { %v435_v16 = vmax.f32 %v430_v14, %v434_v15 }
 0x16a   : > { %v436_v17 = vsub.f32 %v430_v14, %v435_v16  ;;  %537 = vst.msk [vmem:[#allocation3] sm:$0xff] %vm316_vm2, %v435_v16  ;;  %441 = vperm.xlu0 %977, %v435_v16  }
 0x16c   : > { %v437_v44 = vmul.f32 1.442695, %v436_v17 }
 0x16e   : > { %655 = vrot.lane.b32.xlu0 %v908_v19, %s1019_s23 }
 0x1e5   : > { %v442_v20 = vpop.permute.xlu0 %441 }
 0x1e6   : > { %v444_v21 = vsub.f32 %v429_v10, %v442_v20 }
 0x1e8   : > { %v445_v22 = vmul.f32 1.442695, %v444_v21 }
 0x1e9   : > { %v656_v36 = vpop.permute.xlu0 %655 }
 0x1ea   : > { %979 = vpow2.f32 %v445_v22  ;;  %943 = vmatpush3.msra.mxu0 %v656_v36 }
 0x1f7   : > { %v980_v24 = vpop.eup %979 }
 0x1f8   : > { %935 = vmatmul.mubr.msk.f32.vlgmr.msra.gmra.mxu1 %vm431_vm4, %v980_v24  ;;  %v449_v37 = vsel %vm431_vm4, %v980_v24, 0.0 }
 0x1f9   : > { %938 = vmatpush3.xpose.msk.msra.mxu1 %vm321_vm0, %v544_v23  ;;  %939 = vmatprep.mubr.msk.f32.mxu1 %vm1016_vm1, %v1015_v0  ;;  %v647_v0 = vld [vmem:[#allocation5 + $0x8] sm:$0xff] }
 0x1fc   : > { %940 = vmatmul.mubr.msk.f32.vlgmr.msra.gmra.mxu1 %vm321_vm0, %v541_v25 }
 0x2b8   : > { %v531_v26 = vpop.f32.mrf.mxu1 }
 0x2ba   : > { %v936_v27 = vpop.f32.mrf.mxu1 }
 0x2bc   : > { %v616_v28 = vpop.f32.mrf.mxu1 }
 0x2bd   : > { %v620_v29 = vsel %vm344_vm3, %v616_v28, -1e+30 }
 0x2be   : > { %v941_v30 = vpop.f32.mrf.mxu1  ;;  %v623_v31 = vsel %vm431_vm4, %v620_v29, -inf }
 0x2bf   : > { %624 = vmax.xlane.f32.xlu1 %v623_v31 }
 0x348   : > { %v625_v33 = vpop.xlane.xlu1 %624 }
 0x349   : > { %v626_v34 = vmax.f32 %v622_v32, %v625_v33 }
 0x34b   : > { %v627_v35 = vsub.f32 %v622_v32, %v626_v34  ;;  %733 = vst.msk [vmem:[#allocation3 + $0x8] sm:$0xff] %vm316_vm2, %v626_v34  ;;  %632 = vperm.xlu1 %978, %v626_v34  }
 0x34d   : > { %v628_v43 = vmul.f32 1.442695, %v627_v35 }
 0x36f   : > { %450 = vadd.xlane.f32.xlu1 %v449_v37 }
 0x3c6   : > { %v633_v38 = vpop.permute.xlu1 %632 }
 0x3c7   : > { %v635_v39 = vsub.f32 %v620_v29, %v633_v38 }
 0x3c9   : > { %v636_v40 = vmul.f32 1.442695, %v635_v39 }
 0x3cb   : > { %981 = vpow2.f32 %v636_v40 }
 0x3cc   : > { %983 = vpow2.f32 %v628_v43 }
 0x3cd   : > { %985 = vpow2.f32 %v437_v44 }
 0x3d8   : > { %v982_v41 = vpop.eup %981 }
 0x3d9   : > { %945 = vmatmul.mubr.msk.f32.vlgmr.msra.gmra.mxu0 %vm431_vm4, %v982_v41  ;;  %v641_v42 = vsel %vm431_vm4, %v982_v41, 0.0  ;;  %v984_v45 = vpop.eup %983 }
 0x3da   : > { %642 = vadd.xlane.f32.xlu0 %v641_v42  ;;  %v986_v46 = vpop.eup %985  ;;  %v640_v54 = vmul.f32 %v984_v45, %v639_v53 }
 0x3db   : > { %v448_v48 = vmul.f32 %v986_v46, %v447_v47 }
 0x3f0   : > { %650 = vperm.xlu0 %977, %v984_v45  }
 0x3f4   : > { %458 = vperm.xlu0 %977, %v986_v46  }
 0x3f8   : > { %v451_v49 = vpop.xlane.xlu1 %450 }
 0x3f9   : > { %v452_v50 = vadd.f32 %v451_v49, %v448_v48 }
 0x3fb   : > { %454 = vst.msk [vmem:[#allocation4] sm:$0xff] %vm316_vm2, %v452_v50 }
 0x402   : > { %v738_v51 = vld [vmem:[#allocation4] sm:$0xff] }
 0x403   : > { %987 = vrcp.f32 %v738_v51 }
 0x410   : > { %v988_v52 = vpop.eup %987 }
 0x411   : > { %744 = vperm.xlu0 %977, %v988_v52  }
 0x463   : > { %v643_v55 = vpop.xlane.xlu0 %642 }
 0x464   : > { %v644_v56 = vadd.f32 %v643_v55, %v640_v54 }
 0x466   : > { %645 = vst.msk [vmem:[#allocation4 + $0x8] sm:$0xff] %vm316_vm2, %v644_v56 }
 0x46b   : > { %v651_v57 = vpop.permute.xlu0 %650 }
 0x46c   : > { %v653_v1 = vmul.f32 %v651_v57, %v647_v0 }
 0x46d   : > { %v749_v59 = vld [vmem:[#allocation4 + $0x8] sm:$0xff] }
 0x46e   : > { %989 = vrcp.f32 %v749_v59 }
 0x46f   : > { %v459_v60 = vpop.permute.xlu0 %458 }
 0x470   : > { %v461_v61 = vmul.f32 %v459_v60, %v455_v58 }
 0x472   : > { %v535_v62 = vadd.f32 %v531_v26, %v461_v61 }
 0x474   : > { %536 = vst.msk [vmem:[#allocation5] sm:$0xff] %vm321_vm0, %v535_v62 }
 0x47b   : > { %v990_v63 = vpop.eup %989  ;;  %v741_v9 = vld [vmem:[#allocation5] sm:$0xff] }
 0x47c   : > { %756 = vperm.xlu1 %978, %v990_v63  }
 0x48c   : > { %v745_v8 = vpop.permute.xlu0 %744 }
 0x48d   : > { %v747_v10 = vmul.f32 %v745_v8, %v741_v9 }
 0x499   : > { %v727_v2 = vpop.f32.mrf.mxu0 }
 0x49a   : > { %v731_v3 = vadd.f32 %v727_v2, %v653_v1 }
 0x49b   : > { %v946_v4 = vpop.f32.mrf.mxu0 }
 0x49c   : > { %732 = vst.msk [vmem:[#allocation5 + $0x8] sm:$0xff] %vm321_vm0, %v731_v3 }
 0x4a3   : > { %v753_v6 = vld [vmem:[#allocation5 + $0x8] sm:$0xff] }
 0x4f7   : > { %v757_v5 = vpop.permute.xlu1 %756 }
 0x4f8   : > { %v759_v7 = vmul.f32 %v757_v5, %v753_v6 }
 0x4fa   : > { %761 = vrot.lane.b32.xlu0 %v759_v7, %s1019_s23 }
 0x56c   : > { %v762_v11 = vpop.permute.xlu0 %761 }
 0x56d   : > { %v765_v12 = vsel %vm321_vm0, %v747_v10, %v762_v11 }
 0x56e   : > { %766 = vst [vmem:[%s311_s30] sm:$0xff] %v765_v12 }
 0x56f PF: > { %s13_s14 = sadd.s32 1, %s1013_s14   ;;  %s1139_s12 = smov %s1009_s13 }
 0x570   : > { %p10_p5 = scmp.ge.s32.totalorder %s13_s14, 4   ;;  %s1140_s13 = smov %s1142_s15 }
 0x572   :  { %12 = sbr.rel (!%p10_p5) target bundleno = 2 (0x2), region = 87 }

</bundles_post_ra>
